<compile_context>
chip_gen: v7x
topology: tpu7x:2x2x1
jax: 0.10.0
libtpu: 0.0.40
codegen_flags: <defaults>
</compile_context>

<pallas_src>
import math

import jax
import jax.numpy as jnp
from jax.experimental import pallas as pl
from jax.experimental.pallas import tpu as pltpu


def _round_up(x, m):
    return ((x + m - 1) // m) * m


# --------------------------------------------------------------------------
# Kernels
# --------------------------------------------------------------------------
def _gcn_fused_kernel(adj_ref, x_ref, w_ref, b_ref, o_ref, acc_ref):
    """out_tile = (adj_tile @ X) @ W + b, K-tiled over the node axis."""
    k = pl.program_id(1)

    @pl.when(k == 0)
    def _():
        acc_ref[...] = jnp.zeros_like(acc_ref)

    # acc += adj_tile @ X_k   (contraction over N against the narrow in_f dim)
    acc_ref[...] += jnp.dot(adj_ref[...], x_ref[...],
                            preferred_element_type=jnp.float32)

    @pl.when(k == pl.num_programs(1) - 1)
    def _():
        out = jnp.dot(acc_ref[...].astype(w_ref.dtype), w_ref[...],
                      preferred_element_type=jnp.float32)
        o_ref[...] = (out + b_ref[...]).astype(o_ref.dtype)  # epilogue in f32


def _gcn_spmm_kernel(adj_ref, s_ref, b_ref, o_ref, acc_ref):
    """out_tile = adj_tile @ support + b, K-tiled over the node axis."""
    k = pl.program_id(1)

    @pl.when(k == 0)
    def _():
        acc_ref[...] = jnp.zeros_like(acc_ref)

    acc_ref[...] += jnp.dot(adj_ref[...], s_ref[...],
                            preferred_element_type=jnp.float32)

    @pl.when(k == pl.num_programs(1) - 1)
    def _():
        o_ref[...] = (acc_ref[...] + b_ref[...]).astype(o_ref.dtype)


def _matmul_kernel(x_ref, w_ref, o_ref):
    """Row-tiled support = X @ W (only used when in_f > out_f)."""
    o_ref[...] = jnp.dot(x_ref[...], w_ref[...],
                         preferred_element_type=jnp.float32).astype(o_ref.dtype)


# --------------------------------------------------------------------------
# Wrapper
# --------------------------------------------------------------------------
def _choose_tiles(n, rhs_cols, esize, sub):
    """Pick (row tile tm, reduction tile tk, padded N) for the adj contraction."""
    tm = 256 if n >= 256 else _round_up(n, sub)     # fill the 128/256-wide MXU
    n_pad = _round_up(n, tm)
    # Per-step resident stripes (adj row stripe + RHS slab), double-buffered.
    stripe = 2 * tm * n_pad * esize + 2 * n_pad * rhs_cols * esize
    if stripe > (24 << 20):        # only K-tile when full-K would crowd VMEM
        tk = 512
        n_pad = _round_up(n, max(tm, tk))
    else:
        tk = n_pad
    return tm, tk, n_pad


def _vmem_limit(*block_bytes):
    """Explicit VMEM budget (hint); stays under v7x's 64 MiB physical VMEM."""
    est = int(sum(block_bytes) * 1.25) + (4 << 20)
    return min(max(est, 32 << 20), 64 << 20)


def graph_convolution(x, adj, weight, bias=None, *, use_bf16=False):
    """GCN forward: adj @ (x @ weight) + bias.

    x: [N, in_f], adj: [N, N] dense, weight: [in_f, out_f], bias: [out_f]|None.
    use_bf16 feeds the MXU bf16 operands (f32 accumulate) when the model
    tolerates it; default keeps full f32 semantics (mirrors .float()).
    """
    compute_dtype = jnp.bfloat16 if use_bf16 else jnp.float32
    sub = 16 if use_bf16 else 8
    esize = jnp.dtype(compute_dtype).itemsize

    x = x.astype(compute_dtype)
    adj = adj.astype(compute_dtype)
    weight = weight.astype(compute_dtype)

    n, in_f = x.shape
    out_f = weight.shape[1]
    out_f_pad = _round_up(out_f, 128)      # lane-dense output stores

    # Bias kept 2-D f32 ([1, out_f_pad]); epilogue always in f32.
    if bias is None:
        # TODO(synk): bias=False path adds zeros instead of a separate no-bias kernel.
        bias2d = jnp.zeros((1, out_f_pad), jnp.float32)
    else:
        bias2d = jnp.pad(bias.astype(jnp.float32),
                         (0, out_f_pad - out_f)).reshape(1, out_f_pad)

    if out_f_pad != out_f:
        weight = jnp.pad(weight, ((0, 0), (0, out_f_pad - out_f)))

    fused = in_f <= out_f                  # contract N x N against narrower dim
    rhs_cols = in_f if fused else out_f_pad
    tm, tk, n_pad = _choose_tiles(n, rhs_cols, esize, sub)

    if n_pad != n:                         # ragged N handled by zero-padding
        x = jnp.pad(x, ((0, n_pad - n), (0, 0)))
        adj = jnp.pad(adj, ((0, n_pad - n), (0, n_pad - n)))

    grid = (n_pad // tm, n_pad // tk)
    sem = ("parallel", "arbitrary")        # independent row tiles -> v7x megacore

    if fused:
        vmem = _vmem_limit(2 * tm * tk * esize,            # adj tile (dbl-buf)
                           2 * tk * in_f * esize,          # x slab
                           2 * in_f * out_f_pad * esize,   # weight
                           2 * out_f_pad * 4,              # bias
                           2 * tm * out_f_pad * 4,         # out tile
                           tm * in_f * 4)                  # acc scratch
        out = pl.pallas_call(
            _gcn_fused_kernel,
            out_shape=jax.ShapeDtypeStruct((n_pad, out_f_pad), jnp.float32),
            grid_spec=pltpu.PrefetchScalarGridSpec(
                num_scalar_prefetch=0,
                grid=grid,
                in_specs=[
                    pl.BlockSpec((tm, tk), lambda i, k: (i, k)),            # adj
                    pl.BlockSpec((tk, in_f), lambda i, k: (k, 0)),          # x
                    pl.BlockSpec((in_f, out_f_pad), lambda i, k: (0, 0)),   # W
                    pl.BlockSpec((1, out_f_pad), lambda i, k: (0, 0)),      # bias
                ],
                out_specs=pl.BlockSpec((tm, out_f_pad), lambda i, k: (i, 0)),
                scratch_shapes=[pltpu.VMEM((tm, in_f), jnp.float32)],
            ),
            compiler_params=pltpu.CompilerParams(
                dimension_semantics=sem, vmem_limit_bytes=vmem),
        )(adj, x, weight, bias2d)
    else:
        # Precompute support = X @ W (row-tiled, fully parallel) ...
        support = pl.pallas_call(
            _matmul_kernel,
            out_shape=jax.ShapeDtypeStruct((n_pad, out_f_pad), compute_dtype),
            grid_spec=pltpu.PrefetchScalarGridSpec(
                num_scalar_prefetch=0,
                grid=(n_pad // tm,),
                in_specs=[
                    pl.BlockSpec((tm, in_f), lambda i: (i, 0)),
                    pl.BlockSpec((in_f, out_f_pad), lambda i: (0, 0)),
                ],
                out_specs=pl.BlockSpec((tm, out_f_pad), lambda i: (i, 0)),
            ),
            compiler_params=pltpu.CompilerParams(
                dimension_semantics=("parallel",),
                vmem_limit_bytes=_vmem_limit(
                    2 * tm * in_f * esize, 2 * in_f * out_f_pad * esize,
                    2 * tm * out_f_pad * esize)),
        )(x, weight)

        # ... then out = adj @ support + bias.
        vmem = _vmem_limit(2 * tm * tk * esize,
                           2 * tk * out_f_pad * esize,
                           2 * out_f_pad * 4,
                           2 * tm * out_f_pad * 4,
                           tm * out_f_pad * 4)
        out = pl.pallas_call(
            _gcn_spmm_kernel,
            out_shape=jax.ShapeDtypeStruct((n_pad, out_f_pad), jnp.float32),
            grid_spec=pltpu.PrefetchScalarGridSpec(
                num_scalar_prefetch=0,
                grid=grid,
                in_specs=[
                    pl.BlockSpec((tm, tk), lambda i, k: (i, k)),            # adj
                    pl.BlockSpec((tk, out_f_pad), lambda i, k: (k, 0)),     # S
                    pl.BlockSpec((1, out_f_pad), lambda i, k: (0, 0)),      # bias
                ],
                out_specs=pl.BlockSpec((tm, out_f_pad), lambda i, k: (i, 0)),
                scratch_shapes=[pltpu.VMEM((tm, out_f_pad), jnp.float32)],
            ),
            compiler_params=pltpu.CompilerParams(
                dimension_semantics=sem, vmem_limit_bytes=vmem),
        )(adj, support, bias2d)

    return out[:n, :out_f]


# --------------------------------------------------------------------------
# Reference & test
# --------------------------------------------------------------------------
def reference(x, adj, weight, bias):
    support = x.astype(jnp.float32) @ weight.astype(jnp.float32)
    out = adj.astype(jnp.float32) @ support
    if bias is not None:
        out = out + bias.astype(jnp.float32)[None, :]
    return out


if __name__ == "__main__":
    def make_case(key, n, in_f, out_f, with_bias):
        kx, kadj, kw, kb = jax.random.split(key, 4)
        stdv = 1.0 / math.sqrt(out_f)            # mirrors reset_parameters()
        weight = jax.random.uniform(kw, (in_f, out_f), jnp.float32, -stdv, stdv)
        bias = (jax.random.uniform(kb, (out_f,), jnp.float32, -stdv, stdv)
                if with_bias else None)
        x = jax.random.normal(kx, (n, in_f), jnp.float32)
        adj_raw = jax.random.uniform(kadj, (n, n), jnp.float32)
        adj = adj_raw / jnp.sum(adj_raw, axis=1, keepdims=True)
        return x, adj, weight, bias

    k1, k2 = jax.random.split(jax.random.PRNGKey(0))

    # Case 1: in_f < out_f  -> fused (adj_tile @ X) @ W path, with bias.
    x, adj, w, b = make_case(k1, 128, 64, 128, True)
    out = jax.block_until_ready(graph_convolution(x, adj, w, b))
    ref = reference(x, adj, w, b)
    assert out.shape == (128, 128)
    assert jnp.allclose(out, ref, atol=1e-4, rtol=1e-4), "fused path mismatch"

    # Case 2: in_f > out_f, ragged N / out_f, bias=None -> precomputed-support path.
    x2, adj2, w2, b2 = make_case(k2, 120, 96, 48, False)
    out2 = jax.block_until_ready(graph_convolution(x2, adj2, w2, b2))
    ref2 = reference(x2, adj2, w2, b2)
    assert out2.shape == (120, 48)
    assert jnp.allclose(out2, ref2, atol=1e-4, rtol=1e-4), "support path mismatch"

    print("KERNEL_OK")
</pallas_src>

<mosaic_0001>
module attributes {stable_mosaic.version = 11 : i64} {
  func.func @_gcn_fused_kernel(%arg0: i32, %arg1: i32, %arg2: memref<128x128xf32, #tpu.memory_space<vmem>>, %arg3: memref<128x64xf32, #tpu.memory_space<vmem>>, %arg4: memref<64x128xf32, #tpu.memory_space<vmem>>, %arg5: memref<1x128xf32, #tpu.memory_space<vmem>>, %arg6: memref<128x128xf32, #tpu.memory_space<vmem>>, %arg7: memref<128x64xf32, #tpu.memory_space<vmem>>) attributes {dimension_semantics = [#tpu.dimension_semantics<parallel>, #tpu.dimension_semantics<arbitrary>], iteration_bounds = array<i64: 1, 1>, scalar_prefetch = 0 : i64, scratch_operands = 1 : i64, tpu.core_type = #tpu.core_type<tc>, window_params = [{transform_indices = @transform_0, window_bounds = array<i64: 128, 128>}, {transform_indices = @transform_1, window_bounds = array<i64: 128, 64>}, {pipeline_mode = #tpu.pipeline_mode<synchronous>, transform_indices = @transform_2, window_bounds = array<i64: 64, 128>}, {pipeline_mode = #tpu.pipeline_mode<synchronous>, transform_indices = @transform_3, window_bounds = array<i64: 1, 128>}, {transform_indices = @transform_4, window_bounds = array<i64: 128, 128>}]} {
    %c0_i32 = arith.constant 0 : i32
    %0 = arith.cmpi eq, %arg1, %c0_i32 : i32
    %1 = arith.extui %0 : i1 to i32
    %c0_i32_0 = arith.constant 0 : i32
    %2 = arith.cmpi ne, %1, %c0_i32_0 : i32
    scf.if %2 {
      %cst_10 = arith.constant 0.000000e+00 : f32
      %12 = vector.broadcast %cst_10 : f32 to vector<128x64xf32>
      %c0_11 = arith.constant 0 : index
      %c0_12 = arith.constant 0 : index
      %13 = vector.load %arg7[%c0_11, %c0_12] : memref<128x64xf32, #tpu.memory_space<vmem>>, vector<128x64xf32>
      tpu.vector_store %arg7[%c0_11, %c0_12], %12 {strides = array<i32>} : memref<128x64xf32, #tpu.memory_space<vmem>>, vector<128x64xf32>,
    } else {
    }
    %c0 = arith.constant 0 : index
    %c0_1 = arith.constant 0 : index
    %3 = vector.load %arg7[%c0, %c0_1] : memref<128x64xf32, #tpu.memory_space<vmem>>, vector<128x64xf32>
    %c0_2 = arith.constant 0 : index
    %c0_3 = arith.constant 0 : index
    %4 = vector.load %arg2[%c0_2, %c0_3] : memref<128x128xf32, #tpu.memory_space<vmem>>, vector<128x128xf32>
    %c0_4 = arith.constant 0 : index
    %c0_5 = arith.constant 0 : index
    %5 = vector.load %arg3[%c0_4, %c0_5] : memref<128x64xf32, #tpu.memory_space<vmem>>, vector<128x64xf32>
    %cst = arith.constant dense<0.000000e+00> : vector<128x64xf32>
    %6 = tpu.matmul %4, %5, %cst {dimension_numbers = #tpu.dot_dimension_numbers<[1], [0], [0], [1], [0, 0, 1, 1], [], []>} : vector<128x128xf32>, vector<128x64xf32>, vector<128x64xf32> -> vector<128x64xf32>
    %7 = arith.addf %3, %6 : vector<128x64xf32>
    %c0_6 = arith.constant 0 : index
    %c0_7 = arith.constant 0 : index
    %8 = vector.load %arg7[%c0_6, %c0_7] : memref<128x64xf32, #tpu.memory_space<vmem>>, vector<128x64xf32>
    tpu.vector_store %arg7[%c0_6, %c0_7], %7 {strides = array<i32>} : memref<128x64xf32, #tpu.memory_space<vmem>>, vector<128x64xf32>,
    %c0_i32_8 = arith.constant 0 : i32
    %9 = arith.cmpi eq, %arg1, %c0_i32_8 : i32
    %10 = arith.extui %9 : i1 to i32
    %c0_i32_9 = arith.constant 0 : i32
    %11 = arith.cmpi ne, %10, %c0_i32_9 : i32
    scf.if %11 {
      %c0_10 = arith.constant 0 : index
      %c0_11 = arith.constant 0 : index
      %12 = vector.load %arg7[%c0_10, %c0_11] : memref<128x64xf32, #tpu.memory_space<vmem>>, vector<128x64xf32>
      %c0_12 = arith.constant 0 : index
      %c0_13 = arith.constant 0 : index
      %13 = vector.load %arg4[%c0_12, %c0_13] : memref<64x128xf32, #tpu.memory_space<vmem>>, vector<64x128xf32>
      %cst_14 = arith.constant dense<0.000000e+00> : vector<128x128xf32>
      %14 = tpu.matmul %12, %13, %cst_14 {dimension_numbers = #tpu.dot_dimension_numbers<[1], [0], [0], [1], [0, 0, 1, 1], [], []>} : vector<128x64xf32>, vector<64x128xf32>, vector<128x128xf32> -> vector<128x128xf32>
      %c0_15 = arith.constant 0 : index
      %c0_16 = arith.constant 0 : index
      %15 = vector.load %arg5[%c0_15, %c0_16] : memref<1x128xf32, #tpu.memory_space<vmem>>, vector<1x128xf32>
      %16 = vector.broadcast %15 : vector<1x128xf32> to vector<128x128xf32>
      %17 = arith.addf %14, %16 : vector<128x128xf32>
      %c0_17 = arith.constant 0 : index
      %c0_18 = arith.constant 0 : index
      %18 = vector.load %arg6[%c0_17, %c0_18] : memref<128x128xf32, #tpu.memory_space<vmem>>, vector<128x128xf32>
      tpu.vector_store %arg6[%c0_17, %c0_18], %17 {strides = array<i32>} : memref<128x128xf32, #tpu.memory_space<vmem>>, vector<128x128xf32>,
    } else {
    }
    return
  }
  func.func @transform_0(%arg0: i32, %arg1: i32) -> (i32, i32) {
    %c0_i32 = arith.constant 0 : i32
    return %arg0, %arg1 : i32, i32
  }
  func.func @transform_1(%arg0: i32, %arg1: i32) -> (i32, i32) {
    %c0_i32 = arith.constant 0 : i32
    %c0_i32_0 = arith.constant 0 : i32
    return %arg1, %c0_i32 : i32, i32
  }
  func.func @transform_2(%arg0: i32, %arg1: i32) -> (i32, i32) {
    %c0_i32 = arith.constant 0 : i32
    %c0_i32_0 = arith.constant 0 : i32
    %c0_i32_1 = arith.constant 0 : i32
    return %c0_i32, %c0_i32_0 : i32, i32
  }
  func.func @transform_3(%arg0: i32, %arg1: i32) -> (i32, i32) {
    %c0_i32 = arith.constant 0 : i32
    %c0_i32_0 = arith.constant 0 : i32
    %c0_i32_1 = arith.constant 0 : i32
    return %c0_i32, %c0_i32_0 : i32, i32
  }
  func.func @transform_4(%arg0: i32, %arg1: i32) -> (i32, i32) {
    %c0_i32 = arith.constant 0 : i32
    %c0_i32_0 = arith.constant 0 : i32
    return %arg0, %c0_i32 : i32, i32
  }
}

</mosaic_0001>

<bundles_post_ra>
// kernel: tpu_custom_call.1
= control target key start
LH: loop header
LB: loop body
LE: loop exit
PB: predicated region body
PF: predicated region fallthrough
CT: control target
= control target key end

     0   :  { %vm22_vm0 = vcmask 523264   ;;  %v769_v5 = vmov 0.0   ;;  %s981_s0 = inlined_call_operand.vmem [shape: f32[128,128], index: 0, kind: input, shape index: {}]   ;;  %s982_s1 = inlined_call_operand.vmem [shape: f32[128,64], index: 1, kind: input, shape index: {}]   ;;  %s983_s2 = inlined_call_operand.vmem [shape: f32[64,128], index: 2, kind: input, shape index: {}]   ;;  %s984_s3 = inlined_call_operand.vmem [shape: f32[1,128], index: 3, kind: input, shape index: {}]   ;;  %s985_s4 = inlined_call_operand.hbm [shape: f32[128,128], index: 4, kind: output, shape index: {}]  }
   0x1   :  { %v71_v0 = vld [vmem:[%s982_s1] sm:$0xff]  ;;  %v72_v1 = vld [vmem:[%s982_s1 + $0x8] sm:$0xff]  ;;  %v73_v2 = vld [vmem:[%s982_s1 + $0x10] sm:$0xff]  ;;  %24 = vst.msk [vmem:[#allocation2 + $0x8] sm:$0xff] %vm22_vm0, %v769_v5 }
   0x2   :  { %v693_v3 = vpack.c.bf16 %v72_v1, %v71_v0  ;;  %v74_v4 = vld [vmem:[%s982_s1 + $0x18] sm:$0xff]  ;;  %23 = vst.msk [vmem:[#allocation2] sm:$0xff] %vm22_vm0, %v769_v5  ;;  %25 = vst.msk [vmem:[#allocation2 + $0x10] sm:$0xff] %vm22_vm0, %v769_v5  ;;  %v75_v7 = vld [vmem:[%s982_s1 + $0x20] sm:$0xff] }
   0x3   :  { %26 = vst.msk [vmem:[#allocation2 + $0x18] sm:$0xff] %vm22_vm0, %v769_v5  ;;  %27 = vst.msk [vmem:[#allocation2 + $0x20] sm:$0xff] %vm22_vm0, %v769_v5  ;;  %v697_v6 = vpack.c.bf16 %v74_v4, %v73_v2  ;;  %v76_v8 = vld [vmem:[%s982_s1 + $0x28] sm:$0xff]  ;;  %v55_v10 = vld [vmem:[%s981_s0] sm:$0xff] }
   0x4   :  { %28 = vst.msk [vmem:[#allocation2 + $0x28] sm:$0xff] %vm22_vm0, %v769_v5  ;;  %29 = vst.msk [vmem:[#allocation2 + $0x30] sm:$0xff] %vm22_vm0, %v769_v5  ;;  %694 = vmatprep.subr.bf16.mxu0 %v693_v3  ;;  %v701_v9 = vpack.c.bf16 %v76_v8, %v75_v7  ;;  %v77_v11 = vld [vmem:[%s982_s1 + $0x30] sm:$0xff]  ;;  %v78_v12 = vld [vmem:[%s982_s1 + $0x38] sm:$0xff]  ;;  %629 = vmatprep.mubr.f32.mxu0 %v55_v10 }
   0x5   :  { %30 = vst.msk [vmem:[#allocation2 + $0x38] sm:$0xff] %vm22_vm0, %v769_v5  ;;  %31 = vst.msk [vmem:[#allocation2 + $0x40] sm:$0xff] %vm22_vm0, %v769_v5  ;;  %696 = vmatpush3.bf16.msra.mxu0 %v693_v3  ;;  %v705_v13 = vpack.c.bf16 %v78_v12, %v77_v11  ;;  %v79_v14 = vld [vmem:[%s982_s1 + $0x40] sm:$0xff]  ;;  %v80_v15 = vld [vmem:[%s982_s1 + $0x48] sm:$0xff] }
   0x6   :  { %32 = vst.msk [vmem:[#allocation2 + $0x48] sm:$0xff] %vm22_vm0, %v769_v5  ;;  %33 = vst.msk [vmem:[#allocation2 + $0x50] sm:$0xff] %vm22_vm0, %v769_v5  ;;  %698 = vmatprep.subr.bf16.mxu0 %v697_v6  ;;  %v284_v16 = vld [vmem:[%s983_s2] sm:$0xff]  ;;  %v285_v17 = vld [vmem:[%s983_s2 + $0x8] sm:$0xff] }
   0x7   :  { %34 = vst.msk [vmem:[#allocation2 + $0x58] sm:$0xff] %vm22_vm0, %v769_v5  ;;  %35 = vst.msk [vmem:[#allocation2 + $0x60] sm:$0xff] %vm22_vm0, %v769_v5 }
   0x8   :  { %36 = vst.msk [vmem:[#allocation2 + $0x68] sm:$0xff] %vm22_vm0, %v769_v5  ;;  %37 = vst.msk [vmem:[#allocation2 + $0x70] sm:$0xff] %vm22_vm0, %v769_v5 }
   0x9   :  { %38 = vst.msk [vmem:[#allocation2 + $0x78] sm:$0xff] %vm22_vm0, %v769_v5  ;;  %700 = vmatpush3.bf16.msra.mxu0 %v697_v6 }
   0xa   :  { %702 = vmatprep.subr.bf16.mxu0 %v701_v9 }
   0xb   :  { %9 = vsyncpa [#allocation4], 0  ;;  %v725_v18 = vpack.c.bf16 %v285_v17, %v284_v16  ;;  %v709_v19 = vpack.c.bf16 %v80_v15, %v79_v14  ;;  %v81_v20 = vld [vmem:[%s982_s1 + $0x50] sm:$0xff]  ;;  %v82_v21 = vld [vmem:[%s982_s1 + $0x58] sm:$0xff] }
   0xc   :  { %v713_v22 = vpack.c.bf16 %v82_v21, %v81_v20  ;;  %v83_v23 = vld [vmem:[%s982_s1 + $0x60] sm:$0xff]  ;;  %v84_v24 = vld [vmem:[%s982_s1 + $0x68] sm:$0xff]  ;;  %v85_v26 = vld [vmem:[%s982_s1 + $0x70] sm:$0xff] }
   0xd   :  { %704 = vmatpush3.bf16.msra.mxu0 %v701_v9  ;;  %726 = vmatprep.subr.bf16.mxu1 %v725_v18  ;;  %v717_v25 = vpack.c.bf16 %v84_v24, %v83_v23  ;;  %v86_v27 = vld [vmem:[%s982_s1 + $0x78] sm:$0xff]  ;;  %v56_v29 = vld [vmem:[%s981_s0 + $0x8] sm:$0xff]  ;;  %v57_v30 = vld [vmem:[%s981_s0 + $0x10] sm:$0xff] }
   0xe   :  { %706 = vmatprep.subr.bf16.mxu0 %v705_v13  ;;  %728 = vmatpush3.bf16.msra.mxu1 %v725_v18  ;;  %v721_v28 = vpack.c.bf16 %v86_v27, %v85_v26  ;;  %v58_v31 = vld [vmem:[%s981_s0 + $0x18] sm:$0xff]  ;;  %v59_v32 = vld [vmem:[%s981_s0 + $0x20] sm:$0xff]  ;;  %v60_v33 = vld [vmem:[%s981_s0 + $0x28] sm:$0xff] }
   0xf   :  { %v61_v34 = vld [vmem:[%s981_s0 + $0x30] sm:$0xff]  ;;  %v62_v35 = vld [vmem:[%s981_s0 + $0x38] sm:$0xff]  ;;  %v63_v36 = vld [vmem:[%s981_s0 + $0x40] sm:$0xff] }
  0x10   :  { %v64_v37 = vld [vmem:[%s981_s0 + $0x48] sm:$0xff]  ;;  %v65_v38 = vld [vmem:[%s981_s0 + $0x50] sm:$0xff]  ;;  %v66_v39 = vld [vmem:[%s981_s0 + $0x58] sm:$0xff] }
  0x11   :  { %708 = vmatpush3.bf16.msra.mxu0 %v705_v13  ;;  %v67_v40 = vld [vmem:[%s981_s0 + $0x60] sm:$0xff]  ;;  %v68_v41 = vld [vmem:[%s981_s0 + $0x68] sm:$0xff]  ;;  %v69_v42 = vld [vmem:[%s981_s0 + $0x70] sm:$0xff] }
  0x12   :  { %710 = vmatprep.subr.bf16.mxu0 %v709_v19  ;;  %v70_v43 = vld [vmem:[%s981_s0 + $0x78] sm:$0xff]  ;;  %v286_v44 = vld [vmem:[%s983_s2 + $0x10] sm:$0xff]  ;;  %v288_v47 = vld [vmem:[%s983_s2 + $0x20] sm:$0xff] }
  0x13   :  { %v287_v45 = vld [vmem:[%s983_s2 + $0x18] sm:$0xff]  ;;  %v289_v48 = vld [vmem:[%s983_s2 + $0x28] sm:$0xff]  ;;  %v290_v50 = vld [vmem:[%s983_s2 + $0x30] sm:$0xff] }
  0x14   :  { %v729_v46 = vpack.c.bf16 %v287_v45, %v286_v44  ;;  %v733_v49 = vpack.c.bf16 %v289_v48, %v288_v47  ;;  %v291_v51 = vld [vmem:[%s983_s2 + $0x38] sm:$0xff]  ;;  %v40_v53 = vld [vmem:[#allocation2 + $0x8] sm:$0xff]  ;;  %v39_v54 = vld [vmem:[#allocation2] sm:$0xff] }
  0x15   :  { %712 = vmatpush3.bf16.msra.mxu0 %v709_v19  ;;  %v737_v52 = vpack.c.bf16 %v291_v51, %v290_v50  ;;  %v42_v59 = vld [vmem:[#allocation2 + $0x18] sm:$0xff]  ;;  %v41_v60 = vld [vmem:[#allocation2 + $0x10] sm:$0xff]  ;;  %v44_v1 = vld [vmem:[#allocation2 + $0x28] sm:$0xff] }
  0x16   :  { %714 = vmatprep.subr.bf16.mxu0 %v713_v22  ;;  %730 = vmatprep.subr.bf16.mxu1 %v729_v46  ;;  %v43_v2 = vld [vmem:[#allocation2 + $0x20] sm:$0xff]  ;;  %v46_v7 = vld [vmem:[#allocation2 + $0x38] sm:$0xff]  ;;  %v45_v9 = vld [vmem:[#allocation2 + $0x30] sm:$0xff] }
  0x17   :  { %732 = vmatpush3.bf16.msra.mxu1 %v729_v46  ;;  %v48_v15 = vld [vmem:[#allocation2 + $0x48] sm:$0xff]  ;;  %v47_v17 = vld [vmem:[#allocation2 + $0x40] sm:$0xff]  ;;  %v50_v23 = vld [vmem:[#allocation2 + $0x58] sm:$0xff] }
  0x18   :  { %734 = vmatprep.subr.bf16.mxu1 %v733_v49 }
  0x19   :  { %716 = vmatpush3.bf16.msra.mxu0 %v713_v22 }
  0x1a   :  { %718 = vmatprep.subr.bf16.mxu0 %v717_v25 }
  0x1b   :  { %736 = vmatpush3.bf16.msra.mxu1 %v733_v49 }
  0x1c   :  { %738 = vmatprep.subr.bf16.mxu1 %v737_v52 }
  0x1d   :  { %720 = vmatpush3.bf16.msra.mxu0 %v717_v25  ;;  %v49_v25 = vld [vmem:[#allocation2 + $0x50] sm:$0xff] }
  0x1e   :  { %722 = vmatprep.subr.bf16.mxu0 %v721_v28 }
  0x1f   :  { %740 = vmatpush3.bf16.msra.mxu1 %v737_v52 }
  0x21   :  { %724 = vmatpush3.bf16.msra.mxu0 %v721_v28 }
  0x24   :  { %630 = vmatmul.mubr.f32.vlgmr.msra.gmra.mrb[0].mxu0 %v56_v29 }
  0x25   :  { %632 = vmatprep.mubr.f32.mxu0 %v57_v30 }
  0x28   :  { %633 = vmatmul.mubr.f32.gmra.mrb[2].mxu0 %v58_v31  ;;  %v52_v31 = vld [vmem:[#allocation2 + $0x68] sm:$0xff] }
  0x29   :  { %635 = vmatprep.mubr.f32.mxu0 %v59_v32 }
  0x2c   :  { %636 = vmatmul.mubr.f32.gmra.mrb[4].mxu0 %v60_v33  ;;  %v51_v33 = vld [vmem:[#allocation2 + $0x60] sm:$0xff] }
  0x2d   :  { %638 = vmatprep.mubr.f32.mxu0 %v61_v34 }
  0x30   :  { %639 = vmatmul.mubr.f32.gmra.mrb[6].mxu0 %v62_v35 }
  0x31   :  { %641 = vmatprep.mubr.f32.mxu0 %v63_v36 }
  0x34   :  { %642 = vmatmul.mubr.f32.gmra.mrb[8].mxu0 %v64_v37 }
  0x35   :  { %644 = vmatprep.mubr.f32.mxu0 %v65_v38 }
  0x38   :  { %645 = vmatmul.mubr.f32.gmra.mrb[10].mxu0 %v66_v39  ;;  %v54_v39 = vld [vmem:[#allocation2 + $0x78] sm:$0xff] }
  0x39   :  { %647 = vmatprep.mubr.f32.mxu0 %v67_v40 }
  0x3c   :  { %648 = vmatmul.mubr.f32.gmra.mrb[12].mxu0 %v68_v41  ;;  %v53_v41 = vld [vmem:[#allocation2 + $0x70] sm:$0xff] }
  0x3d   :  { %650 = vmatprep.mubr.f32.mxu0 %v69_v42 }
  0x40   :  { %651 = vmatmul.mubr.f32.gmra.mrb[14].mxu0 %v70_v43 }
  0xf7   :  { %v631_v55 = vpop.f32.mrb[0].mxu0 }
  0xf8   :  { %v233_v56 = vadd.f32 %v631_v55, %v40_v53  ;;  %v153_v57 = vpop.f32.mrb[1].mxu0  ;;  %v524_v53 = vld [vmem:[%s984_s3] ss:$0 sm:$0xff]  ;;  %s770_s3 = smov [#allocation3]  }
  0xf9   :  { %v232_v58 = vadd.f32 %v153_v57, %v39_v54  ;;  %s513_s15 = sshll.u32 %s770_s3, 4  ;;  %s514_s15 = int_to_ptr.vmem [resolvable:$true] %s513_s15 }
  0xfa   :  { %250 = vst.msk [vmem:[#allocation2 + $0x8] sm:$0xff] %vm22_vm0, %v233_v56  ;;  %s745_s16 = scalar_lea.vmem %s514_s15, 2048  ;;  %p750_p1 = scmp.lt.s32.totalorder %s514_s15, %s514_s15 }
  0xfb   :  { %249 = vst.msk [vmem:[#allocation2] sm:$0xff] %vm22_vm0, %v232_v58  ;;  %v634_v61 = vpop.f32.mrb[2].mxu0  ;;  %p746_p0 = scmp.ne.s32.totalorder %s514_s15, %s745_s16  ;;  %p751_p2 = scmp.lt.s32.totalorder %s745_s16, %s745_s16 }
  0xfc   :  { %v235_v62 = vadd.f32 %v634_v61, %v42_v59  ;;  %v163_v63 = vpop.f32.mrb[3].mxu0 }
  0xfd   :  { %v234_v0 = vadd.f32 %v163_v63, %v41_v60  ;;  %p752_p3 = por %p751_p2, %p750_p1 }
  0xfe   :  { %252 = vst.msk [vmem:[#allocation2 + $0x18] sm:$0xff] %vm22_vm0, %v235_v62 }
  0xff   :  { %251 = vst.msk [vmem:[#allocation2 + $0x10] sm:$0xff] %vm22_vm0, %v234_v0  ;;  %v637_v3 = vpop.f32.mrb[4].mxu0  ;;  %p753_p4 = pnand %p752_p3, %p746_p0 }
 0x100   :  { %v237_v4 = vadd.f32 %v637_v3, %v44_v1  ;;  %v173_v5 = vpop.f32.mrb[5].mxu0 }
 0x101   :  { %v236_v6 = vadd.f32 %v173_v5, %v43_v2  ;;  %v269_v11 = vld [vmem:[#allocation2 + $0x8] sm:$0xff] }
 0x102   :  { %254 = vst.msk [vmem:[#allocation2 + $0x28] sm:$0xff] %vm22_vm0, %v237_v4  ;;  %v268_v8 = vld [vmem:[#allocation2] sm:$0xff] }
 0x103   :  { %253 = vst.msk [vmem:[#allocation2 + $0x20] sm:$0xff] %vm22_vm0, %v236_v6  ;;  %v640_v10 = vpop.f32.mrb[6].mxu0  ;;  %669 = vmatprep.mubr.msk.f32.mxu1 %vm22_vm0, %v268_v8 }
 0x104   :  { %v239_v12 = vadd.f32 %v640_v10, %v46_v7  ;;  %v183_v13 = vpop.f32.mrb[7].mxu0  ;;  %670 = vmatmul.mubr.msk.f32.vlgmr.msra.gmra.mrb[0].mxu1 %vm22_vm0, %v269_v11 }
 0x105   :  { %v238_v14 = vadd.f32 %v183_v13, %v45_v9  ;;  %v271_v19 = vld [vmem:[#allocation2 + $0x18] sm:$0xff] }
 0x106   :  { %256 = vst.msk [vmem:[#allocation2 + $0x38] sm:$0xff] %vm22_vm0, %v239_v12  ;;  %v270_v16 = vld [vmem:[#allocation2 + $0x10] sm:$0xff] }
 0x107   :  { %255 = vst.msk [vmem:[#allocation2 + $0x30] sm:$0xff] %vm22_vm0, %v238_v14  ;;  %v643_v18 = vpop.f32.mrb[8].mxu0  ;;  %672 = vmatprep.mubr.msk.f32.mxu1 %vm22_vm0, %v270_v16 }
 0x108   :  { %v241_v20 = vadd.f32 %v643_v18, %v48_v15  ;;  %v193_v21 = vpop.f32.mrb[9].mxu0  ;;  %673 = vmatmul.mubr.msk.f32.gmra.mrb[2].mxu1 %vm22_vm0, %v271_v19 }
 0x109   :  { %v240_v22 = vadd.f32 %v193_v21, %v47_v17  ;;  %v273_v27 = vld [vmem:[#allocation2 + $0x28] sm:$0xff] }
 0x10a   :  { %258 = vst.msk [vmem:[#allocation2 + $0x48] sm:$0xff] %vm22_vm0, %v241_v20  ;;  %v272_v24 = vld [vmem:[#allocation2 + $0x20] sm:$0xff] }
 0x10b   :  { %257 = vst.msk [vmem:[#allocation2 + $0x40] sm:$0xff] %vm22_vm0, %v240_v22  ;;  %v646_v26 = vpop.f32.mrb[10].mxu0  ;;  %675 = vmatprep.mubr.msk.f32.mxu1 %vm22_vm0, %v272_v24 }
 0x10c   :  { %v243_v28 = vadd.f32 %v646_v26, %v50_v23  ;;  %v203_v29 = vpop.f32.mrb[11].mxu0  ;;  %676 = vmatmul.mubr.msk.f32.gmra.mrb[4].mxu1 %vm22_vm0, %v273_v27 }
 0x10d   :  { %v242_v30 = vadd.f32 %v203_v29, %v49_v25  ;;  %v275_v35 = vld [vmem:[#allocation2 + $0x38] sm:$0xff] }
 0x10e   :  { %260 = vst.msk [vmem:[#allocation2 + $0x58] sm:$0xff] %vm22_vm0, %v243_v28  ;;  %v274_v32 = vld [vmem:[#allocation2 + $0x30] sm:$0xff] }
 0x10f   :  { %259 = vst.msk [vmem:[#allocation2 + $0x50] sm:$0xff] %vm22_vm0, %v242_v30  ;;  %v649_v34 = vpop.f32.mrb[12].mxu0  ;;  %678 = vmatprep.mubr.msk.f32.mxu1 %vm22_vm0, %v274_v32 }
 0x110   :  { %v245_v36 = vadd.f32 %v649_v34, %v52_v31  ;;  %v213_v37 = vpop.f32.mrb[13].mxu0  ;;  %679 = vmatmul.mubr.msk.f32.gmra.mrb[6].mxu1 %vm22_vm0, %v275_v35 }
 0x111   :  { %v244_v38 = vadd.f32 %v213_v37, %v51_v33  ;;  %v277_v43 = vld [vmem:[#allocation2 + $0x48] sm:$0xff] }
 0x112   :  { %262 = vst.msk [vmem:[#allocation2 + $0x68] sm:$0xff] %vm22_vm0, %v245_v36  ;;  %v276_v40 = vld [vmem:[#allocation2 + $0x40] sm:$0xff] }
 0x113   :  { %261 = vst.msk [vmem:[#allocation2 + $0x60] sm:$0xff] %vm22_vm0, %v244_v38  ;;  %v652_v42 = vpop.f32.mrb[14].mxu0  ;;  %681 = vmatprep.mubr.msk.f32.mxu1 %vm22_vm0, %v276_v40 }
 0x114   :  { %v247_v44 = vadd.f32 %v652_v42, %v54_v39  ;;  %v223_v45 = vpop.f32.mrb[15].mxu0  ;;  %682 = vmatmul.mubr.msk.f32.gmra.mrb[8].mxu1 %vm22_vm0, %v277_v43 }
 0x115   :  { %v246_v46 = vadd.f32 %v223_v45, %v53_v41  ;;  %v279_v48 = vld [vmem:[#allocation2 + $0x58] sm:$0xff] }
 0x116   :  { %264 = vst.msk [vmem:[#allocation2 + $0x78] sm:$0xff] %vm22_vm0, %v247_v44  ;;  %v278_v47 = vld [vmem:[#allocation2 + $0x50] sm:$0xff] }
 0x117   :  { %263 = vst.msk [vmem:[#allocation2 + $0x70] sm:$0xff] %vm22_vm0, %v246_v46  ;;  %684 = vmatprep.mubr.msk.f32.mxu1 %vm22_vm0, %v278_v47 }
 0x118   :  { %685 = vmatmul.mubr.msk.f32.gmra.mrb[10].mxu1 %vm22_vm0, %v279_v48 }
 0x119   :  { %v281_v50 = vld [vmem:[#allocation2 + $0x68] sm:$0xff] }
 0x11a   :  { %v280_v49 = vld [vmem:[#allocation2 + $0x60] sm:$0xff] }
 0x11b   :  { %687 = vmatprep.mubr.msk.f32.mxu1 %vm22_vm0, %v280_v49 }
 0x11c   :  { %688 = vmatmul.mubr.msk.f32.gmra.mrb[12].mxu1 %vm22_vm0, %v281_v50 }
 0x11d   :  { %v283_v52 = vld [vmem:[#allocation2 + $0x78] sm:$0xff] }
 0x11e   :  { %v282_v51 = vld [vmem:[#allocation2 + $0x70] sm:$0xff] }
 0x11f   :  { %690 = vmatprep.mubr.msk.f32.mxu1 %vm22_vm0, %v282_v51 }
 0x120   :  { %691 = vmatmul.mubr.msk.f32.gmra.mrb[14].mxu1 %vm22_vm0, %v283_v52 }
 0x1d7   :  { %v671_v54 = vpop.f32.mrb[0].mxu1 }
 0x1d8   :  { %v419_v55 = vadd.f32 %v671_v54, %v524_v53  ;;  %v413_v56 = vpop.f32.mrb[1].mxu1 }
 0x1d9   :  { %v414_v57 = vadd.f32 %v524_v53, %v413_v56 }
 0x1da   :  { %493 = vst [vmem:[#allocation3 + $0x8] sm:$0xff] %v419_v55 }
 0x1db   :  { %492 = vst [vmem:[#allocation3] sm:$0xff] %v414_v57  ;;  %v674_v58 = vpop.f32.mrb[2].mxu1 }
 0x1dc   :  { %v429_v59 = vadd.f32 %v674_v58, %v524_v53  ;;  %v423_v60 = vpop.f32.mrb[3].mxu1 }
 0x1dd   :  { %v424_v61 = vadd.f32 %v524_v53, %v423_v60 }
 0x1de   :  { %495 = vst [vmem:[#allocation3 + $0x18] sm:$0xff] %v429_v59 }
 0x1df   :  { %494 = vst [vmem:[#allocation3 + $0x10] sm:$0xff] %v424_v61  ;;  %v677_v62 = vpop.f32.mrb[4].mxu1 }
 0x1e0   :  { %v439_v63 = vadd.f32 %v677_v62, %v524_v53  ;;  %v433_v0 = vpop.f32.mrb[5].mxu1 }
 0x1e1   :  { %v434_v1 = vadd.f32 %v524_v53, %v433_v0 }
 0x1e2   :  { %497 = vst [vmem:[#allocation3 + $0x28] sm:$0xff] %v439_v63 }
 0x1e3   :  { %496 = vst [vmem:[#allocation3 + $0x20] sm:$0xff] %v434_v1  ;;  %v680_v2 = vpop.f32.mrb[6].mxu1 }
 0x1e4   :  { %v449_v3 = vadd.f32 %v680_v2, %v524_v53  ;;  %v443_v4 = vpop.f32.mrb[7].mxu1 }
 0x1e5   :  { %v444_v5 = vadd.f32 %v524_v53, %v443_v4 }
 0x1e6   :  { %499 = vst [vmem:[#allocation3 + $0x38] sm:$0xff] %v449_v3 }
 0x1e7   :  { %498 = vst [vmem:[#allocation3 + $0x30] sm:$0xff] %v444_v5  ;;  %v683_v6 = vpop.f32.mrb[8].mxu1 }
 0x1e8   :  { %v459_v7 = vadd.f32 %v683_v6, %v524_v53  ;;  %v453_v8 = vpop.f32.mrb[9].mxu1 }
 0x1e9   :  { %v454_v9 = vadd.f32 %v524_v53, %v453_v8 }
 0x1ea   :  { %501 = vst [vmem:[#allocation3 + $0x48] sm:$0xff] %v459_v7 }
 0x1eb   :  { %500 = vst [vmem:[#allocation3 + $0x40] sm:$0xff] %v454_v9  ;;  %v686_v10 = vpop.f32.mrb[10].mxu1 }
 0x1ec   :  { %v469_v11 = vadd.f32 %v686_v10, %v524_v53  ;;  %v463_v12 = vpop.f32.mrb[11].mxu1 }
 0x1ed   :  { %v464_v13 = vadd.f32 %v524_v53, %v463_v12 }
 0x1ee   :  { %503 = vst [vmem:[#allocation3 + $0x58] sm:$0xff] %v469_v11 }
 0x1ef   :  { %502 = vst [vmem:[#allocation3 + $0x50] sm:$0xff] %v464_v13  ;;  %v689_v14 = vpop.f32.mrb[12].mxu1 }
 0x1f0   :  { %v479_v15 = vadd.f32 %v689_v14, %v524_v53  ;;  %v473_v16 = vpop.f32.mrb[13].mxu1 }
 0x1f1   :  { %v474_v17 = vadd.f32 %v524_v53, %v473_v16 }
 0x1f2   :  { %505 = vst [vmem:[#allocation3 + $0x68] sm:$0xff] %v479_v15 }
 0x1f3   :  { %504 = vst [vmem:[#allocation3 + $0x60] sm:$0xff] %v474_v17  ;;  %v692_v18 = vpop.f32.mrb[14].mxu1 }
 0x1f4   :  { %v489_v19 = vadd.f32 %v692_v18, %v524_v53  ;;  %v483_v20 = vpop.f32.mrb[15].mxu1 }
 0x1f5   :  { %v484_v21 = vadd.f32 %v524_v53, %v483_v20 }
 0x1f6   :  { %507 = vst [vmem:[#allocation3 + $0x78] sm:$0xff] %v489_v19 }
 0x1f7   :  { %506 = vst [vmem:[#allocation3 + $0x70] sm:$0xff] %v484_v21 }
 0x1f8   :  { %756 = shalt.err (!%p753_p4)
}
 0x1f9   :  { %s757_s19 = scalar_lea.hbm %s985_s4, 2048 }
 0x1fa   :  { %p758_p5 = scmp.ne.s32.totalorder %s985_s4, %s757_s19  ;;  %p761_p6 = scmp.lt.u32.totalorder %s757_s19, %s985_s4 }
 0x1fc   :  { %p763_p7 = pnand %p761_p6, %p758_p5 }
 0x1fe   :  { %766 = shalt.err (!%p763_p7)
}
 0x1ff   :  { %s771_s24 = smov 128   ;;  %s772_s25 = smov 8  }
 0x200   :  { %519 = dma.vmem_to_hbm [thread:$0]  %s514_s15, 2048, %s985_s4, [#allocation4], %s771_s24, %s771_s24, %s772_s25  }
 0x201   :  { %767 = dma.done.wait [#allocation4], 2048  }
 0x202   :  { %768 = vsyncadd [#allocation4], 4294965248 }
 0x203   :  { %523 = vsyncpa [#allocation4], 1 }

</bundles_post_ra>
